<compile_context>
chip_gen: v6e
topology: v6e:2x2x1
jax: 0.10.0
libtpu: 0.0.40
codegen_flags: <defaults>
</compile_context>

<pallas_src>
import jax
import jax.numpy as jnp
from jax.experimental import pallas as pl
from jax.experimental.pallas import tpu as pltpu


# ----------------------------------------------------------------------------
# helpers
# ----------------------------------------------------------------------------
def _round_up(x, m):
    return ((x + m - 1) // m) * m


def _pick_tile(dim_pad, preferred):
    """Largest multiple of 128 that is <= preferred and divides dim_pad."""
    t = min(preferred, dim_pad)
    while dim_pad % t:
        t -= 128
    return t


def _pad2(x, rows, cols, dtype):
    out = jnp.zeros((rows, cols), dtype)
    return out.at[: x.shape[0], : x.shape[1]].set(x.astype(dtype))


_VMEM_LIMIT = 48 * 1024 * 1024  # headroom below v7x's 64 MiB physical VMEM


# ----------------------------------------------------------------------------
# Kernel 1: per-node projection  P_l = X @ W_l (bf16 out), P_r = X @ W_r (f32)
# ----------------------------------------------------------------------------
def _project_kernel(x_ref, wl_ref, wr_ref, pl_out_ref, pr_out_ref):
    x = x_ref[...].astype(jnp.bfloat16)
    pl_out_ref[...] = jnp.dot(
        x, wl_ref[...], preferred_element_type=jnp.float32
    ).astype(jnp.bfloat16)
    pr_out_ref[...] = jnp.dot(x, wr_ref[...], preferred_element_type=jnp.float32)


def project(x, w_l, w_r, *, tm):
    n_pad, f_in_pad = x.shape
    f_out_pad = w_l.shape[1]
    flops = 2 * n_pad * f_in_pad * (2 * f_out_pad)
    bytes_accessed = (
        x.size * 4
        + (w_l.size + w_r.size) * 2
        + n_pad * f_out_pad * (2 + 4)
    )
    return pl.pallas_call(
        _project_kernel,
        out_shape=(
            jax.ShapeDtypeStruct((n_pad, f_out_pad), jnp.bfloat16),
            jax.ShapeDtypeStruct((n_pad, f_out_pad), jnp.float32),
        ),
        grid_spec=pltpu.PrefetchScalarGridSpec(
            num_scalar_prefetch=0,
            grid=(n_pad // tm,),
            in_specs=[
                pl.BlockSpec((tm, f_in_pad), lambda i: (i, 0)),
                pl.BlockSpec((f_in_pad, f_out_pad), lambda i: (0, 0)),
                pl.BlockSpec((f_in_pad, f_out_pad), lambda i: (0, 0)),
            ],
            out_specs=(
                pl.BlockSpec((tm, f_out_pad), lambda i: (i, 0)),
                pl.BlockSpec((tm, f_out_pad), lambda i: (i, 0)),
            ),
        ),
        compiler_params=pltpu.CompilerParams(
            dimension_semantics=("parallel",),
            vmem_limit_bytes=_VMEM_LIMIT,
        ),
        cost_estimate=pl.CostEstimate(
            flops=flops, transcendentals=0, bytes_accessed=bytes_accessed
        ),
    )(x, w_l, w_r)


# ----------------------------------------------------------------------------
# Kernel 2: tiled aggregation  out = relu(A_mean @ P_l + P_r + b)
#   grid = (M tiles, F_out tiles, K tiles over nodes), f32 VMEM accumulator
# ----------------------------------------------------------------------------
def _aggregate_kernel(a_ref, plft_ref, prgt_ref, b_ref, o_ref, acc_ref):
    k = pl.program_id(2)

    @pl.when(k == 0)
    def _():
        acc_ref[...] = jnp.zeros_like(acc_ref)

    acc_ref[...] += jnp.dot(
        a_ref[...], plft_ref[...], preferred_element_type=jnp.float32
    )

    @pl.when(k == pl.num_programs(2) - 1)
    def _():
        h = acc_ref[...] + prgt_ref[...] + b_ref[...]
        o_ref[...] = jnp.maximum(h, 0.0)


def aggregate(a, p_l, p_r, b, *, tm, tn, tk):
    n_pad = a.shape[0]
    f_out_pad = p_l.shape[1]
    grid = (n_pad // tm, f_out_pad // tn, n_pad // tk)
    flops = 2 * n_pad * n_pad * f_out_pad
    bytes_accessed = (
        a.size * 2
        + p_l.size * 2 * max(grid[0], 1)
        + p_r.size * 4
        + b.size * 4
        + n_pad * f_out_pad * 4
    )
    return pl.pallas_call(
        _aggregate_kernel,
        out_shape=jax.ShapeDtypeStruct((n_pad, f_out_pad), jnp.float32),
        grid_spec=pltpu.PrefetchScalarGridSpec(
            num_scalar_prefetch=0,
            grid=grid,
            in_specs=[
                pl.BlockSpec((tm, tk), lambda i, j, k: (i, k)),   # A_mean
                pl.BlockSpec((tk, tn), lambda i, j, k: (k, j)),   # P_l
                pl.BlockSpec((tm, tn), lambda i, j, k: (i, j)),   # P_r
                pl.BlockSpec((1, tn), lambda i, j, k: (0, j)),    # bias
            ],
            out_specs=pl.BlockSpec((tm, tn), lambda i, j, k: (i, j)),
            scratch_shapes=[pltpu.VMEM((tm, tn), jnp.float32)],
        ),
        compiler_params=pltpu.CompilerParams(
            dimension_semantics=("parallel", "parallel", "arbitrary"),
            vmem_limit_bytes=_VMEM_LIMIT,
        ),
        cost_estimate=pl.CostEstimate(
            flops=flops, transcendentals=0, bytes_accessed=bytes_accessed
        ),
    )(a, p_l, p_r, b)


# ----------------------------------------------------------------------------
# Plain-JAX glue
# ----------------------------------------------------------------------------
def build_mean_adjacency(edge_index, num_nodes, n_pad):
    """Row-normalized dense adjacency, padded to (n_pad, n_pad), bf16.
    (A_mean @ X)[i] = mean over incoming edges (j -> i) of X[j]; padded
    rows/cols stay zero so padded nodes never contribute."""
    src = edge_index[0]
    dst = edge_index[1]
    a = jnp.zeros((n_pad, n_pad), jnp.float32)
    a = a.at[dst, src].add(1.0)
    deg = jnp.sum(a, axis=1, keepdims=True)
    a = a / jnp.maximum(deg, 1.0)
    return a.astype(jnp.bfloat16)


class GNNConvPallas:
    """JAX/Pallas mirror of GNNConv('SAGEConv', aggregation='mean',
    residual=False, l_norm=False, dropout -> eval-mode identity)."""

    def __init__(self, input_dim, hidden_dim, out_dim=None, num_layers=2, key=None):
        self.input_dim = input_dim
        self.hidden_dim = hidden_dim
        self.out_dim = out_dim if out_dim is not None else hidden_dim
        if key is None:
            key = jax.random.PRNGKey(0)

        self.params = []       # padded bf16 weights + padded f32 bias
        self.params_f32 = []   # unpadded f32 (bf16-rounded) for reference
        in_dim = input_dim
        for i in range(num_layers):
            o_dim = hidden_dim if i != num_layers - 1 else self.out_dim
            key, k_l, k_r = jax.random.split(key, 3)
            scale = 1.0 / jnp.sqrt(jnp.float32(in_dim))
            w_l = jax.random.normal(k_l, (in_dim, o_dim), jnp.float32) * scale
            w_r = jax.random.normal(k_r, (in_dim, o_dim), jnp.float32) * scale
            b = jnp.zeros((o_dim,), jnp.float32)
            # round weights to bf16 (what the MXU will consume)
            w_l_bf = w_l.astype(jnp.bfloat16)
            w_r_bf = w_r.astype(jnp.bfloat16)

            in_pad = _round_up(in_dim, 128)
            o_pad = _round_up(o_dim, 128)
            self.params.append(
                (
                    _pad2(w_l_bf, in_pad, o_pad, jnp.bfloat16),
                    _pad2(w_r_bf, in_pad, o_pad, jnp.bfloat16),
                    _pad2(b.reshape(1, -1), 1, o_pad, jnp.float32),
                    o_pad,
                )
            )
            self.params_f32.append(
                (w_l_bf.astype(jnp.float32), w_r_bf.astype(jnp.float32), b)
            )
            in_dim = hidden_dim

    def __call__(self, in_feat, edge_index, edge_attr=None):
        # edge_attr unused: SAGEConv is not a headed model (is_headed_model()=False)
        n, f_in = in_feat.shape
        n_pad = _round_up(n, 128)
        f_in_pad = _round_up(f_in, 128)

        a_mean = build_mean_adjacency(edge_index, n, n_pad)
        h = _pad2(in_feat, n_pad, f_in_pad, jnp.float32)

        for (w_l, w_r, b, f_out_pad) in self.params:
            tm_p = _pick_tile(n_pad, 256)
            p_l, p_r = project(h, w_l, w_r, tm=tm_p)
            tm = _pick_tile(n_pad, 256)
            tn = _pick_tile(f_out_pad, 256)
            tk = _pick_tile(n_pad, 512)
            # conv layer + activate() (ReLU only; l_norm=False, dropout eval-mode)
            h = aggregate(a_mean, p_l, p_r, b, tm=tm, tn=tn, tk=tk)

        return h[:n, : self.out_dim]


def reference_forward(in_feat, edge_index, params_f32, num_nodes):
    """Pure-JAX f32 reference (weights bf16-rounded, A bf16-rounded to match
    what the kernel consumes)."""
    src, dst = edge_index[0], edge_index[1]
    a = jnp.zeros((num_nodes, num_nodes), jnp.float32).at[dst, src].add(1.0)
    deg = jnp.maximum(jnp.sum(a, axis=1, keepdims=True), 1.0)
    a = (a / deg).astype(jnp.bfloat16).astype(jnp.float32)
    h = in_feat.astype(jnp.float32)
    for (w_l, w_r, b) in params_f32:
        agg = a @ h
        h = jnp.maximum(agg @ w_l + h @ w_r + b, 0.0)
    return h


# ----------------------------------------------------------------------------
# Demo / smoke test
# ----------------------------------------------------------------------------
if __name__ == "__main__":
    key = jax.random.PRNGKey(0)
    k_feat, k_src, k_dst, k_params = jax.random.split(key, 4)

    num_nodes = 16
    num_edges = 48
    input_dim = 16
    hidden_dim = 32
    out_dim = 32

    in_feat = jax.random.normal(k_feat, (num_nodes, input_dim), jnp.float32)
    edge_index = jnp.stack(
        [
            jax.random.randint(k_src, (num_edges,), 0, num_nodes, dtype=jnp.int32),
            jax.random.randint(k_dst, (num_edges,), 0, num_nodes, dtype=jnp.int32),
        ],
        axis=0,
    )

    model = GNNConvPallas(
        input_dim, hidden_dim, out_dim=out_dim, num_layers=2, key=k_params
    )

    out = model(in_feat, edge_index)
    out = jax.block_until_ready(out)

    assert out.shape == (num_nodes, out_dim)
    assert bool(jnp.all(jnp.isfinite(out)))
    assert bool(jnp.all(out >= 0.0))  # final ReLU applied

    ref = reference_forward(in_feat, edge_index, model.params_f32, num_nodes)
    assert bool(
        jnp.allclose(out, ref, rtol=3e-2, atol=3e-2)
    ), f"max abs diff {float(jnp.max(jnp.abs(out - ref)))}"

    print("KERNEL_OK")
</pallas_src>

<mosaic_0001>
module attributes {stable_mosaic.version = 11 : i64} {
  func.func @_project_kernel(%arg0: i32, %arg1: memref<128x128xf32, #tpu.memory_space<vmem>>, %arg2: memref<128x128xbf16, #tpu.memory_space<vmem>>, %arg3: memref<128x128xbf16, #tpu.memory_space<vmem>>, %arg4: memref<128x128xbf16, #tpu.memory_space<vmem>>, %arg5: memref<128x128xf32, #tpu.memory_space<vmem>>) attributes {dimension_semantics = [#tpu.dimension_semantics<parallel>], iteration_bounds = array<i64: 1>, scalar_prefetch = 0 : i64, scratch_operands = 0 : i64, tpu.core_type = #tpu.core_type<tc>, window_params = [{transform_indices = @transform_0, window_bounds = array<i64: 128, 128>}, {pipeline_mode = #tpu.pipeline_mode<synchronous>, transform_indices = @transform_1, window_bounds = array<i64: 128, 128>}, {pipeline_mode = #tpu.pipeline_mode<synchronous>, transform_indices = @transform_2, window_bounds = array<i64: 128, 128>}, {transform_indices = @transform_3, window_bounds = array<i64: 128, 128>}, {transform_indices = @transform_4, window_bounds = array<i64: 128, 128>}]} {
    %c0 = arith.constant 0 : index
    %c0_0 = arith.constant 0 : index
    %0 = vector.load %arg1[%c0, %c0_0] : memref<128x128xf32, #tpu.memory_space<vmem>>, vector<128x128xf32>
    %1 = arith.truncf %0 : vector<128x128xf32> to vector<128x128xbf16>
    %c0_1 = arith.constant 0 : index
    %c0_2 = arith.constant 0 : index
    %2 = vector.load %arg2[%c0_1, %c0_2] : memref<128x128xbf16, #tpu.memory_space<vmem>>, vector<128x128xbf16>
    %cst = arith.constant dense<0.000000e+00> : vector<128x128xf32>
    %3 = tpu.matmul %1, %2, %cst {dimension_numbers = #tpu.dot_dimension_numbers<[1], [0], [0], [1], [0, 0, 1, 1], [], []>} : vector<128x128xbf16>, vector<128x128xbf16>, vector<128x128xf32> -> vector<128x128xf32>
    %4 = arith.truncf %3 : vector<128x128xf32> to vector<128x128xbf16>
    %c0_3 = arith.constant 0 : index
    %c0_4 = arith.constant 0 : index
    %5 = vector.load %arg4[%c0_3, %c0_4] : memref<128x128xbf16, #tpu.memory_space<vmem>>, vector<128x128xbf16>
    tpu.vector_store %arg4[%c0_3, %c0_4], %4 {strides = array<i32>} : memref<128x128xbf16, #tpu.memory_space<vmem>>, vector<128x128xbf16>,
    %c0_5 = arith.constant 0 : index
    %c0_6 = arith.constant 0 : index
    %6 = vector.load %arg3[%c0_5, %c0_6] : memref<128x128xbf16, #tpu.memory_space<vmem>>, vector<128x128xbf16>
    %cst_7 = arith.constant dense<0.000000e+00> : vector<128x128xf32>
    %7 = tpu.matmul %1, %6, %cst_7 {dimension_numbers = #tpu.dot_dimension_numbers<[1], [0], [0], [1], [0, 0, 1, 1], [], []>} : vector<128x128xbf16>, vector<128x128xbf16>, vector<128x128xf32> -> vector<128x128xf32>
    %c0_8 = arith.constant 0 : index
    %c0_9 = arith.constant 0 : index
    %8 = vector.load %arg5[%c0_8, %c0_9] : memref<128x128xf32, #tpu.memory_space<vmem>>, vector<128x128xf32>
    tpu.vector_store %arg5[%c0_8, %c0_9], %7 {strides = array<i32>} : memref<128x128xf32, #tpu.memory_space<vmem>>, vector<128x128xf32>,
    return
  }
  func.func @transform_0(%arg0: i32) -> (i32, i32) {
    %c0_i32 = arith.constant 0 : i32
    %c0_i32_0 = arith.constant 0 : i32
    return %arg0, %c0_i32 : i32, i32
  }
  func.func @transform_1(%arg0: i32) -> (i32, i32) {
    %c0_i32 = arith.constant 0 : i32
    %c0_i32_0 = arith.constant 0 : i32
    %c0_i32_1 = arith.constant 0 : i32
    return %c0_i32, %c0_i32_0 : i32, i32
  }
  func.func @transform_2(%arg0: i32) -> (i32, i32) {
    %c0_i32 = arith.constant 0 : i32
    %c0_i32_0 = arith.constant 0 : i32
    %c0_i32_1 = arith.constant 0 : i32
    return %c0_i32, %c0_i32_0 : i32, i32
  }
  func.func @transform_3(%arg0: i32) -> (i32, i32) {
    %c0_i32 = arith.constant 0 : i32
    %c0_i32_0 = arith.constant 0 : i32
    return %arg0, %c0_i32 : i32, i32
  }
  func.func @transform_4(%arg0: i32) -> (i32, i32) {
    %c0_i32 = arith.constant 0 : i32
    %c0_i32_0 = arith.constant 0 : i32
    return %arg0, %c0_i32 : i32, i32
  }
}

</mosaic_0001>

<bundles_post_ra>
// kernel: tpu_custom_call.1
= control target key start
LH: loop header
LB: loop body
LE: loop exit
PB: predicated region body
PF: predicated region fallthrough
CT: control target
= control target key end

     0   :  { %10 = vsyncpa [#allocation3], 0  ;;  %s924_s0 = inlined_call_operand.hbm [shape: f32[128,128], index: 0, kind: input, shape index: {}]   ;;  %s925_s1 = inlined_call_operand.hbm [shape: bf16[128,128], index: 1, kind: input, shape index: {}]   ;;  %s926_s2 = inlined_call_operand.hbm [shape: bf16[128,128], index: 2, kind: input, shape index: {}]   ;;  %s927_s3 = inlined_call_operand.hbm [shape: bf16[128,128], index: 3, kind: output, shape index: {0}]   ;;  %s928_s4 = inlined_call_operand.hbm [shape: f32[128,128], index: 4, kind: output, shape index: {1}]  }
   0x1   :  { %11 = vsyncpa [#allocation6], 0 }
   0x2   :  { %12 = vsyncpa [#allocation4], 0 }
   0x3   :  { %13 = vsyncpa [#allocation10], 0  ;;  %s860_s15 = smov [#allocation5]  }
   0x4   :  { %s31_s16 = sshll.u32 %s860_s15, 4  ;;  %s32_s16 = int_to_ptr.vmem [resolvable:$true] %s31_s16 }
   0x5   :  { %s760_s17 = scalar_lea.vmem %s32_s16, 1024  ;;  %p765_p1 = scmp.lt.s32.totalorder %s32_s16, %s32_s16 }
   0x6   :  { %p761_p0 = scmp.ne.s32.totalorder %s32_s16, %s760_s17  ;;  %p766_p2 = scmp.lt.s32.totalorder %s760_s17, %s760_s17 }
   0x8   :  { %p767_p3 = por %p766_p2, %p765_p1 }
   0xa   :  { %p768_p4 = pnand %p767_p3, %p761_p0 }
   0xc   :  { %771 = shalt.err (!%p768_p4)
}
   0xd   :  { %s861_s18 = smov 64   ;;  %s862_s19 = smov 4  }
   0xe   :  { %37 = dma.hbm_to_vmem [thread:$0]  %s925_s1, 1024, %s32_s16, [#allocation6], %s861_s18, %s861_s18, %s862_s19  }
   0xf   :  { %s863_s22 = smov [#allocation2]  }
  0x10   :  { %s19_s23 = sshll.u32 %s863_s22, 4  ;;  %s20_s23 = int_to_ptr.vmem [resolvable:$true] %s19_s23 }
  0x11   :  { %s780_s24 = scalar_lea.vmem %s20_s23, 2048  ;;  %p785_p6 = scmp.lt.s32.totalorder %s20_s23, %s20_s23 }
  0x12   :  { %p781_p5 = scmp.ne.s32.totalorder %s20_s23, %s780_s24  ;;  %p786_p7 = scmp.lt.s32.totalorder %s780_s24, %s780_s24 }
  0x14   :  { %p787_p8 = por %p786_p7, %p785_p6 }
  0x16   :  { %p788_p9 = pnand %p787_p8, %p781_p5 }
  0x18   :  { %791 = shalt.err (!%p788_p9)
}
  0x19   :  { %s864_s25 = smov 128   ;;  %s865_s26 = smov 8  }
  0x1a   :  { %25 = dma.hbm_to_vmem [thread:$0]  %s924_s0, 2048, %s20_s23, [#allocation3], %s864_s25, %s864_s25, %s865_s26  }
  0x1b   :  { %s866_s1 = smov [#allocation7]  }
  0x1c   :  { %s43_s29 = sshll.u32 %s866_s1, 4  ;;  %s44_s29 = int_to_ptr.vmem [resolvable:$true] %s43_s29 }
  0x1d   :  { %s800_s30 = scalar_lea.vmem %s44_s29, 1024  ;;  %p805_p11 = scmp.lt.s32.totalorder %s44_s29, %s44_s29 }
  0x1e   :  { %p801_p10 = scmp.ne.s32.totalorder %s44_s29, %s800_s30  ;;  %p806_p12 = scmp.lt.s32.totalorder %s800_s30, %s800_s30 }
  0x20   :  { %p807_p13 = por %p806_p12, %p805_p11 }
  0x22   :  { %p808_p0 = pnand %p807_p13, %p801_p10 }
  0x24   :  { %811 = shalt.err (!%p808_p0)
}
  0x25   :  { %49 = dma.hbm_to_vmem [thread:$0]  %s926_s2, 1024, %s44_s29, [#allocation6], %s861_s18, %s861_s18, %s862_s19  }
  0x26   :  { %852 = dma.done.wait [#allocation3], 2048  }
  0x27   :  { %853 = vsyncadd [#allocation3], 4294965248 }
  0x28   :  { %854 = dma.done.wait [#allocation6], 2048  }
  0x29   :  { %855 = vsyncadd [#allocation6], 4294965248  ;;  %v736_v0 = vld [vmem:[#allocation5 + $0x38] sm:$0xff]   ;;  %v738_v2 = vld [vmem:[#allocation5 + $0x30] sm:$0xff]   ;;  %s867_s0 = smov [#allocation9]   ;;  %s868_s7 = smov [#allocation8]  }
  0x2a   :  { %v737_v1 = vld [vmem:[#allocation7 + $0x38] sm:$0xff]   ;;  %663 = vmatprep.subr.bf16.mxu0 %v736_v0  ;;  %v739_v3 = vld [vmem:[#allocation7 + $0x30] sm:$0xff]   ;;  %v740_v4 = vld [vmem:[#allocation5 + $0x28] sm:$0xff]   ;;  %s519_s2 = sshll.u32 %s867_s0, 4  ;;  %s507_s8 = sshll.u32 %s868_s7, 4  ;;  %s520_s2 = int_to_ptr.vmem [resolvable:$true] %s519_s2  ;;  %s508_s8 = int_to_ptr.vmem [resolvable:$true] %s507_s8 }
  0x2b   :  { %695 = vmatprep.subr.bf16.mxu1 %v737_v1  ;;  %664 = vmatpush3.bf16.msra.mxu0 %v736_v0  ;;  %v741_v5 = vld [vmem:[#allocation7 + $0x28] sm:$0xff]   ;;  %v742_v6 = vld [vmem:[#allocation5 + $0x20] sm:$0xff]   ;;  %v744_v8 = vld [vmem:[#allocation5 + $0x18] sm:$0xff]   ;;  %s812_s9 = scalar_lea.vmem %s520_s2, 2048  ;;  %p817_p2 = scmp.lt.s32.totalorder %s520_s2, %s520_s2 }
  0x2c   :  { %696 = vmatpush3.bf16.msra.mxu1 %v737_v1  ;;  %665 = vmatprep.subr.bf16.mxu0 %v738_v2  ;;  %v743_v7 = vld [vmem:[#allocation7 + $0x20] sm:$0xff]   ;;  %v745_v9 = vld [vmem:[#allocation7 + $0x18] sm:$0xff]   ;;  %v746_v10 = vld [vmem:[#allocation5 + $0x10] sm:$0xff]   ;;  %p813_p1 = scmp.ne.s32.totalorder %s520_s2, %s812_s9  ;;  %p818_p3 = scmp.lt.s32.totalorder %s812_s9, %s812_s9 }
  0x2d   :  { %697 = vmatprep.subr.bf16.mxu1 %v739_v3  ;;  %v60_v11 = vld [vmem:[#allocation2] sm:$0xff]  ;;  %v61_v12 = vld [vmem:[#allocation2 + $0x8] sm:$0xff]  ;;  %v747_v13 = vld [vmem:[#allocation7 + $0x10] sm:$0xff]  }
  0x2e   :  { %v76_v14 = vpack.c.bf16 %v61_v12, %v60_v11  ;;  %v748_v15 = vld [vmem:[#allocation5 + $0x8] sm:$0xff]   ;;  %v750_v17 = vld [vmem:[#allocation5] sm:$0xff]   ;;  %v62_v19 = vld [vmem:[#allocation2 + $0x10] sm:$0xff]  ;;  %p819_p4 = por %p818_p3, %p817_p2 }
  0x2f   :  { %666 = vmatpush3.bf16.msra.mxu0 %v738_v2  ;;  %v749_v16 = vld [vmem:[#allocation7 + $0x8] sm:$0xff]   ;;  %v751_v18 = vld [vmem:[#allocation7] sm:$0xff]   ;;  %v63_v20 = vld [vmem:[#allocation2 + $0x18] sm:$0xff] }
  0x30   :  { %698 = vmatpush3.bf16.msra.mxu1 %v739_v3  ;;  %667 = vmatprep.subr.bf16.mxu0 %v740_v4  ;;  %v64_v21 = vld [vmem:[#allocation2 + $0x20] sm:$0xff]  ;;  %v65_v22 = vld [vmem:[#allocation2 + $0x28] sm:$0xff]  ;;  %v77_v23 = vpack.c.bf16 %v63_v20, %v62_v19  ;;  %v66_v25 = vld [vmem:[#allocation2 + $0x30] sm:$0xff]  ;;  %p820_p5 = pnand %p819_p4, %p813_p1 }
  0x31   :  { %699 = vmatprep.subr.bf16.mxu1 %v741_v5  ;;  %679 = vmatprep.mubr.bf16.mxu0 %v76_v14  ;;  %v78_v24 = vpack.c.bf16 %v65_v22, %v64_v21  ;;  %v67_v26 = vld [vmem:[#allocation2 + $0x38] sm:$0xff]  ;;  %v68_v27 = vld [vmem:[#allocation2 + $0x40] sm:$0xff]  ;;  %v69_v28 = vld [vmem:[#allocation2 + $0x48] sm:$0xff] }
  0x32   :  { %711 = vmatprep.mubr.bf16.mxu1 %v76_v14  ;;  %v79_v29 = vpack.c.bf16 %v67_v26, %v66_v25  ;;  %v80_v30 = vpack.c.bf16 %v69_v28, %v68_v27  ;;  %v70_v31 = vld [vmem:[#allocation2 + $0x50] sm:$0xff]  ;;  %v71_v32 = vld [vmem:[#allocation2 + $0x58] sm:$0xff]  ;;  %v72_v33 = vld [vmem:[#allocation2 + $0x60] sm:$0xff] }
  0x33   :  { %668 = vmatpush3.bf16.msra.mxu0 %v740_v4  ;;  %v73_v34 = vld [vmem:[#allocation2 + $0x68] sm:$0xff]  ;;  %v81_v35 = vpack.c.bf16 %v71_v32, %v70_v31  ;;  %v74_v37 = vld [vmem:[#allocation2 + $0x70] sm:$0xff]  ;;  %v75_v38 = vld [vmem:[#allocation2 + $0x78] sm:$0xff] }
  0x34   :  { %700 = vmatpush3.bf16.msra.mxu1 %v741_v5  ;;  %669 = vmatprep.subr.bf16.mxu0 %v742_v6  ;;  %v82_v36 = vpack.c.bf16 %v73_v34, %v72_v33  ;;  %v83_v39 = vpack.c.bf16 %v75_v38, %v74_v37 }
  0x35   :  { %701 = vmatprep.subr.bf16.mxu1 %v743_v7 }
  0x37   :  { %670 = vmatpush3.bf16.msra.mxu0 %v742_v6 }
  0x38   :  { %702 = vmatpush3.bf16.msra.mxu1 %v743_v7  ;;  %671 = vmatprep.subr.bf16.mxu0 %v744_v8 }
  0x39   :  { %703 = vmatprep.subr.bf16.mxu1 %v745_v9 }
  0x3b   :  { %672 = vmatpush3.bf16.msra.mxu0 %v744_v8 }
  0x3c   :  { %704 = vmatpush3.bf16.msra.mxu1 %v745_v9  ;;  %673 = vmatprep.subr.bf16.mxu0 %v746_v10 }
  0x3d   :  { %705 = vmatprep.subr.bf16.mxu1 %v747_v13 }
  0x3f   :  { %674 = vmatpush3.bf16.msra.mxu0 %v746_v10 }
  0x40   :  { %706 = vmatpush3.bf16.msra.mxu1 %v747_v13  ;;  %675 = vmatprep.subr.bf16.mxu0 %v748_v15 }
  0x41   :  { %707 = vmatprep.subr.bf16.mxu1 %v749_v16 }
  0x43   :  { %676 = vmatpush3.bf16.msra.mxu0 %v748_v15 }
  0x44   :  { %708 = vmatpush3.bf16.msra.mxu1 %v749_v16  ;;  %677 = vmatprep.subr.bf16.mxu0 %v750_v17 }
  0x45   :  { %709 = vmatprep.subr.bf16.mxu1 %v751_v18 }
  0x47   :  { %678 = vmatpush3.bf16.msra.mxu0 %v750_v17 }
  0x48   :  { %710 = vmatpush3.bf16.msra.mxu1 %v751_v18 }
  0x4a   :  { %680 = vmatmul.mubr.bf16.vlgmr.msra.gmra.mxu0 %v77_v23 }
  0x4b   :  { %712 = vmatmul.mubr.bf16.vlgmr.msra.gmra.mxu1 %v77_v23  ;;  %683 = vmatprep.mubr.bf16.mxu0 %v78_v24 }
  0x4c   :  { %715 = vmatprep.mubr.bf16.mxu1 %v78_v24 }
  0x52   :  { %684 = vmatmul.mubr.bf16.gmra.mxu0 %v79_v29 }
  0x53   :  { %716 = vmatmul.mubr.bf16.gmra.mxu1 %v79_v29  ;;  %687 = vmatprep.mubr.bf16.mxu0 %v80_v30 }
  0x54   :  { %719 = vmatprep.mubr.bf16.mxu1 %v80_v30 }
  0x5a   :  { %688 = vmatmul.mubr.bf16.gmra.mxu0 %v81_v35 }
  0x5b   :  { %720 = vmatmul.mubr.bf16.gmra.mxu1 %v81_v35  ;;  %691 = vmatprep.mubr.bf16.mxu0 %v82_v36 }
  0x5c   :  { %723 = vmatprep.mubr.bf16.mxu1 %v82_v36 }
  0x62   :  { %692 = vmatmul.mubr.bf16.gmra.mxu0 %v83_v39 }
  0x63   :  { %724 = vmatmul.mubr.bf16.gmra.mxu1 %v83_v39 }
 0x10a   :  { %v681_v40 = vpop.f32.mrf.mxu0 }
 0x10b   :  { %v713_v41 = vpop.f32.mrf.mxu1 }
 0x10c   :  { %488 = vst [vmem:[#allocation9 + $0x10] sm:$0xff] %v713_v41  ;;  %v182_v42 = vpop.f32.mrf.mxu0 }
 0x10d   :  { %v423_v43 = vpop.f32.mrf.mxu1 }
 0x10e   :  { %486 = vst [vmem:[#allocation9] sm:$0xff] %v423_v43  ;;  %v682_v44 = vpop.f32.mrf.mxu0 }
 0x10f   :  { %v592_v45 = vpack.c.bf16 %v682_v44, %v681_v40  ;;  %v714_v46 = vpop.f32.mrf.mxu1 }
 0x110   :  { %489 = vst [vmem:[#allocation9 + $0x18] sm:$0xff] %v714_v46  ;;  %v185_v47 = vpop.f32.mrf.mxu0 }
 0x111   :  { %624 = vst [vmem:[#allocation8 + $0x8] sm:$0xff] %v592_v45   ;;  %v587_v48 = vpack.c.bf16 %v185_v47, %v182_v42  ;;  %v426_v49 = vpop.f32.mrf.mxu1 }
 0x112   :  { %487 = vst [vmem:[#allocation9 + $0x8] sm:$0xff] %v426_v49  ;;  %v685_v50 = vpop.f32.mrf.mxu0 }
 0x113   :  { %588 = vst [vmem:[#allocation8] sm:$0xff] %v587_v48   ;;  %v717_v51 = vpop.f32.mrf.mxu1 }
 0x114   :  { %492 = vst [vmem:[#allocation9 + $0x30] sm:$0xff] %v717_v51  ;;  %v198_v52 = vpop.f32.mrf.mxu0 }
 0x115   :  { %v439_v53 = vpop.f32.mrf.mxu1 }
 0x116   :  { %490 = vst [vmem:[#allocation9 + $0x20] sm:$0xff] %v439_v53  ;;  %v686_v54 = vpop.f32.mrf.mxu0 }
 0x117   :  { %v602_v55 = vpack.c.bf16 %v686_v54, %v685_v50  ;;  %v718_v56 = vpop.f32.mrf.mxu1 }
 0x118   :  { %493 = vst [vmem:[#allocation9 + $0x38] sm:$0xff] %v718_v56  ;;  %v201_v57 = vpop.f32.mrf.mxu0 }
 0x119   :  { %626 = vst [vmem:[#allocation8 + $0x18] sm:$0xff] %v602_v55   ;;  %v597_v58 = vpack.c.bf16 %v201_v57, %v198_v52  ;;  %v442_v59 = vpop.f32.mrf.mxu1 }
 0x11a   :  { %491 = vst [vmem:[#allocation9 + $0x28] sm:$0xff] %v442_v59  ;;  %v689_v60 = vpop.f32.mrf.mxu0 }
 0x11b   :  { %625 = vst [vmem:[#allocation8 + $0x10] sm:$0xff] %v597_v58   ;;  %v721_v61 = vpop.f32.mrf.mxu1 }
 0x11c   :  { %496 = vst [vmem:[#allocation9 + $0x50] sm:$0xff] %v721_v61  ;;  %v214_v62 = vpop.f32.mrf.mxu0 }
 0x11d   :  { %v455_v63 = vpop.f32.mrf.mxu1 }
 0x11e   :  { %494 = vst [vmem:[#allocation9 + $0x40] sm:$0xff] %v455_v63  ;;  %v690_v0 = vpop.f32.mrf.mxu0 }
 0x11f   :  { %v612_v1 = vpack.c.bf16 %v690_v0, %v689_v60  ;;  %v722_v2 = vpop.f32.mrf.mxu1 }
 0x120   :  { %497 = vst [vmem:[#allocation9 + $0x58] sm:$0xff] %v722_v2  ;;  %v217_v3 = vpop.f32.mrf.mxu0 }
 0x121   :  { %628 = vst [vmem:[#allocation8 + $0x28] sm:$0xff] %v612_v1   ;;  %v607_v4 = vpack.c.bf16 %v217_v3, %v214_v62  ;;  %v458_v5 = vpop.f32.mrf.mxu1 }
 0x122   :  { %495 = vst [vmem:[#allocation9 + $0x48] sm:$0xff] %v458_v5  ;;  %v693_v6 = vpop.f32.mrf.mxu0 }
 0x123   :  { %627 = vst [vmem:[#allocation8 + $0x20] sm:$0xff] %v607_v4   ;;  %v725_v7 = vpop.f32.mrf.mxu1 }
 0x124   :  { %500 = vst [vmem:[#allocation9 + $0x70] sm:$0xff] %v725_v7  ;;  %v230_v8 = vpop.f32.mrf.mxu0 }
 0x125   :  { %v471_v9 = vpop.f32.mrf.mxu1 }
 0x126   :  { %498 = vst [vmem:[#allocation9 + $0x60] sm:$0xff] %v471_v9  ;;  %v694_v10 = vpop.f32.mrf.mxu0 }
 0x127   :  { %v622_v11 = vpack.c.bf16 %v694_v10, %v693_v6  ;;  %v726_v12 = vpop.f32.mrf.mxu1 }
 0x128   :  { %501 = vst [vmem:[#allocation9 + $0x78] sm:$0xff] %v726_v12  ;;  %v233_v13 = vpop.f32.mrf.mxu0 }
 0x129   :  { %630 = vst [vmem:[#allocation8 + $0x38] sm:$0xff] %v622_v11   ;;  %v617_v14 = vpack.c.bf16 %v233_v13, %v230_v8  ;;  %v474_v15 = vpop.f32.mrf.mxu1 }
 0x12a   :  { %499 = vst [vmem:[#allocation9 + $0x68] sm:$0xff] %v474_v15 }
 0x12b   :  { %629 = vst [vmem:[#allocation8 + $0x30] sm:$0xff] %v617_v14  }
 0x12c   :  { %823 = shalt.err (!%p820_p5)
}
 0x12d   :  { %525 = dma.vmem_to_hbm [thread:$0]  %s520_s2, 2048, %s928_s4, [#allocation10], %s864_s25, %s864_s25, %s865_s26  }
 0x12e   :  { %s832_s12 = scalar_lea.vmem %s508_s8, 1024  ;;  %p837_p7 = scmp.lt.s32.totalorder %s508_s8, %s508_s8 }
 0x12f   :  { %p833_p6 = scmp.ne.s32.totalorder %s508_s8, %s832_s12  ;;  %p838_p8 = scmp.lt.s32.totalorder %s832_s12, %s832_s12 }
 0x131   :  { %p839_p9 = por %p838_p8, %p837_p7 }
 0x133   :  { %p840_p10 = pnand %p839_p9, %p833_p6 }
 0x135   :  { %843 = shalt.err (!%p840_p10)
}
 0x136   :  { %513 = dma.vmem_to_hbm [thread:$0]  %s508_s8, 1024, %s927_s3, [#allocation4], %s861_s18, %s861_s18, %s862_s19  }
 0x137   :  { %856 = dma.done.wait [#allocation4], 1024  }
 0x138   :  { %857 = vsyncadd [#allocation4], 4294966272 }
 0x139   :  { %858 = dma.done.wait [#allocation10], 2048  }
 0x13a   :  { %859 = vsyncadd [#allocation10], 4294965248 }
 0x13b   :  { %532 = vsyncpa [#allocation3], 1 }
 0x13c   :  { %533 = vsyncpa [#allocation6], 1 }
 0x13d   :  { %534 = vsyncpa [#allocation4], 1 }
 0x13e   :  { %535 = vsyncpa [#allocation10], 1 }

</bundles_post_ra>
